<compile_context>
chip_gen: v7x
topology: tpu7x:2x2x1
jax: 0.10.0
libtpu: 0.0.40
codegen_flags: <defaults>
</compile_context>

<pallas_src>
import jax
import jax.numpy as jnp
from jax.experimental import pallas as pl
from jax.experimental.pallas import tpu as pltpu

EPS = 1e-3
EPS2 = EPS * EPS
_LANES = 128


def _make_kernel(n, block_rows, acc_rows, lanes, steps_per_chunk):
    block_elems = block_rows * lanes
    chains = block_rows // acc_rows

    def kernel(x_ref, y_ref, out_ref):
        c = pl.program_id(0)   # parallel chunk (megacore axis)
        i = pl.program_id(1)   # reduction step within the chunk

        @pl.when(i == 0)
        def _():
            out_ref[...] = jnp.zeros_like(out_ref)

        # Logical (unclamped) block index for this step.  The index_map clamps
        # overflow steps of the last chunk onto the previous valid block (so
        # their DMA is elided); their contribution is masked to zero here.
        rb = c * steps_per_chunk + i
        base = rb * block_elems
        is_interior = base + block_elems <= n

        def accumulate(val):
            # (block_rows, lanes) -> (acc_rows, lanes): many independent
            # accumulation chains keep all VALU slots busy.
            partial = val.reshape(chains, acc_rows, lanes).sum(axis=0)
            out_ref[...] += partial[None, :, :]

        @pl.when(is_interior)
        def _fast():
            # Hot path: no masking at all.
            d = x_ref[...].astype(jnp.float32) - y_ref[...].astype(jnp.float32)
            accumulate(jnp.sqrt(d * d + jnp.float32(EPS2)))

        @pl.when(jnp.logical_not(is_interior))
        def _masked():
            # Boundary block (ragged tail / Pallas-padded rows) or a fully
            # out-of-range overflow step: mask block-local index >= remaining.
            remaining = n - base
            row_ids = jax.lax.broadcasted_iota(jnp.int32, (block_rows, lanes), 0)
            lane_ids = jax.lax.broadcasted_iota(jnp.int32, (block_rows, lanes), 1)
            mask = (row_ids * lanes + lane_ids) < remaining
            d = x_ref[...].astype(jnp.float32) - y_ref[...].astype(jnp.float32)
            val = jnp.sqrt(d * d + jnp.float32(EPS2))
            accumulate(jnp.where(mask, val, jnp.float32(0.0)))

    return kernel


def _default_num_parallel():
    # Only v7x-class chips have 2 TensorCores; elsewhere the parallel axis is
    # a serial outer loop that just adds bookkeeping.
    try:
        kind = jax.devices()[0].device_kind.lower()
        if "v7" in kind:
            return 2
    except Exception:
        pass
    return 1


def charbonnier_loss(x, y, *, block_rows=None, num_parallel=None):
    """Pallas Charbonnier loss: mean(sqrt((x - y)^2 + eps^2)). Returns f32 scalar."""
    assert x.shape == y.shape, "input and target must have the same shape"
    n = x.size
    assert n > 0
    assert n < 2 ** 31, "int32 index math inside the kernel requires n < 2**31"
    lanes = _LANES

    if block_rows is None:
        # ~2 MiB per input tile regardless of dtype (4096 rows f32, 8192 bf16):
        # 2 inputs x 2 pipeline buffers = 8 MiB live, under the 32 MiB limit
        # set below and leaving room for elementwise intermediates.
        itemsize = jnp.dtype(x.dtype).itemsize
        block_rows = max(64, (2 * 1024 * 1024) // (itemsize * lanes))
    if num_parallel is None:
        num_parallel = _default_num_parallel()

    # Flatten (free).  Pad only if numel is not a multiple of one (8,128) tile;
    # padded / out-of-bounds elements are masked inside the kernel (boundary
    # step only), so the result is exact.
    tile_elems = 8 * lanes
    n_pad = (-n) % tile_elems
    xf = x.reshape(-1)
    yf = y.reshape(-1)
    if n_pad:
        xf = jnp.pad(xf, (0, n_pad))
        yf = jnp.pad(yf, (0, n_pad))
    rows = (n + n_pad) // lanes                     # multiple of 8

    x2 = xf.reshape(rows, lanes)
    y2 = yf.reshape(rows, lanes)

    br = min(block_rows, rows)
    br = max(8, (br // 8) * 8)                      # multiple of 8
    acc_rows = 64 if br % 64 == 0 else 8            # independent accum chains

    total_blocks = pl.cdiv(rows, br)
    num_parallel = max(1, min(num_parallel, total_blocks))
    steps_per_chunk = pl.cdiv(total_blocks, num_parallel)

    def in_map(c, i):
        # Overflow steps of the last chunk clamp to the previous valid block
        # (same block index as the prior step -> DMA elided by the pipeline);
        # the kernel masks their contribution to zero.
        return (jnp.minimum(c * steps_per_chunk + i, total_blocks - 1), 0)

    partials = pl.pallas_call(
        _make_kernel(n, br, acc_rows, lanes, steps_per_chunk),
        out_shape=jax.ShapeDtypeStruct((num_parallel, acc_rows, lanes), jnp.float32),
        grid_spec=pltpu.PrefetchScalarGridSpec(
            num_scalar_prefetch=0,
            grid=(num_parallel, steps_per_chunk),
            in_specs=[
                pl.BlockSpec((br, lanes), in_map),
                pl.BlockSpec((br, lanes), in_map),
            ],
            out_specs=pl.BlockSpec((1, acc_rows, lanes), lambda c, i: (c, 0, 0)),
        ),
        compiler_params=pltpu.CompilerParams(
            dimension_semantics=("parallel", "arbitrary"),
            vmem_limit_bytes=32 * 1024 * 1024,
        ),
    )(x2, y2)

    # Final cross-lane reduction + mean in plain JAX (tiny).
    return jnp.sum(partials) / jnp.float32(n)


def _ref_loss(x, y):
    xf = x.astype(jnp.float32)
    yf = y.astype(jnp.float32)
    return jnp.mean(jnp.sqrt((xf - yf) ** 2 + jnp.float32(EPS2)))


if __name__ == "__main__":
    key = jax.random.PRNGKey(0)

    # Main check: NCHW, matching the PyTorch convention (interior fast path).
    k1, k2 = jax.random.split(key)
    x = jax.random.normal(k1, (2, 4, 16, 16), dtype=jnp.float32)
    y = jax.random.normal(k2, (2, 4, 16, 16), dtype=jnp.float32)
    out = jax.block_until_ready(jax.jit(charbonnier_loss)(x, y))
    assert jnp.allclose(out, _ref_loss(x, y), rtol=1e-5, atol=1e-6), out

    # Ragged tail: numel not a multiple of 1024 -> exercises the masked
    # boundary branch.
    k3, k4 = jax.random.split(k1)
    xa = jax.random.normal(k3, (3, 3, 7, 5), dtype=jnp.float32)
    ya = jax.random.normal(k4, (3, 3, 7, 5), dtype=jnp.float32)
    outa = jax.block_until_ready(jax.jit(charbonnier_loss)(xa, ya))
    assert jnp.allclose(outa, _ref_loss(xa, ya), rtol=1e-5, atol=1e-6), outa

    # Multi-block grid + 2-way parallel axis + clamped overflow step
    # (small block_rows so the grid has >1 block at a small shape).
    k5, k6 = jax.random.split(k2)
    xb = jax.random.normal(k5, (2, 4, 16, 24), dtype=jnp.float32)  # 3072 elems
    yb = jax.random.normal(k6, (2, 4, 16, 24), dtype=jnp.float32)
    small = jax.jit(lambda a, b: charbonnier_loss(a, b, block_rows=8, num_parallel=2))
    outb = jax.block_until_ready(small(xb, yb))
    assert jnp.allclose(outb, _ref_loss(xb, yb), rtol=1e-5, atol=1e-6), outb

    # Native bf16 inputs (cast to f32 per-tile inside the kernel; dtype-scaled
    # block_rows).
    xc = x.astype(jnp.bfloat16)
    yc = y.astype(jnp.bfloat16)
    outc = jax.block_until_ready(jax.jit(charbonnier_loss)(xc, yc))
    assert jnp.allclose(outc, _ref_loss(xc, yc), rtol=1e-4, atol=1e-5), outc

    print("KERNEL_OK")
</pallas_src>

<mosaic_0001>
module attributes {stable_mosaic.version = 11 : i64} {
  func.func @kernel(%arg0: i32, %arg1: i32, %arg2: memref<16x128xf32, #tpu.memory_space<vmem>>, %arg3: memref<16x128xf32, #tpu.memory_space<vmem>>, %arg4: memref<1x8x128xf32, #tpu.memory_space<vmem>>) attributes {dimension_semantics = [#tpu.dimension_semantics<parallel>, #tpu.dimension_semantics<arbitrary>], iteration_bounds = array<i64: 1, 1>, scalar_prefetch = 0 : i64, scratch_operands = 0 : i64, tpu.core_type = #tpu.core_type<tc>, window_params = [{transform_indices = @transform_0, window_bounds = array<i64: 16, 128>}, {transform_indices = @transform_1, window_bounds = array<i64: 16, 128>}, {transform_indices = @transform_2, window_bounds = array<i64: 1, 8, 128>}]} {
    %c0_i32 = arith.constant 0 : i32
    %0 = arith.cmpi eq, %arg1, %c0_i32 : i32
    %1 = arith.extui %0 : i1 to i32
    %c0_i32_0 = arith.constant 0 : i32
    %2 = arith.cmpi ne, %1, %c0_i32_0 : i32
    scf.if %2 {
      %cst = arith.constant 0.000000e+00 : f32
      %13 = vector.broadcast %cst : f32 to vector<1x8x128xf32>
      %c0 = arith.constant 0 : index
      %c0_5 = arith.constant 0 : index
      %c0_6 = arith.constant 0 : index
      %14 = vector.load %arg4[%c0, %c0_5, %c0_6] : memref<1x8x128xf32, #tpu.memory_space<vmem>>, vector<1x8x128xf32>
      tpu.vector_store %arg4[%c0, %c0_5, %c0_6], %13 {strides = array<i32>} : memref<1x8x128xf32, #tpu.memory_space<vmem>>, vector<1x8x128xf32>,
    } else {
    }
    %c1_i32 = arith.constant 1 : i32
    %3 = arith.muli %arg0, %c1_i32 : i32
    %4 = arith.addi %3, %arg1 : i32
    %c2048_i32 = arith.constant 2048 : i32
    %5 = arith.muli %4, %c2048_i32 : i32
    %c2048_i32_1 = arith.constant 2048 : i32
    %6 = arith.addi %5, %c2048_i32_1 : i32
    %c2048_i32_2 = arith.constant 2048 : i32
    %7 = arith.cmpi sle, %6, %c2048_i32_2 : i32
    %8 = arith.extui %7 : i1 to i32
    %c0_i32_3 = arith.constant 0 : i32
    %9 = arith.cmpi ne, %8, %c0_i32_3 : i32
    scf.if %9 {
      %c0 = arith.constant 0 : index
      %c0_5 = arith.constant 0 : index
      %13 = vector.load %arg2[%c0, %c0_5] : memref<16x128xf32, #tpu.memory_space<vmem>>, vector<16x128xf32>
      %c0_6 = arith.constant 0 : index
      %c0_7 = arith.constant 0 : index
      %14 = vector.load %arg3[%c0_6, %c0_7] : memref<16x128xf32, #tpu.memory_space<vmem>>, vector<16x128xf32>
      %15 = arith.subf %13, %14 : vector<16x128xf32>
      %16 = arith.mulf %15, %15 : vector<16x128xf32>
      %cst = arith.constant 9.99999997E-7 : f32
      %17 = vector.broadcast %cst : f32 to vector<16x128xf32>
      %18 = arith.addf %16, %17 : vector<16x128xf32>
      %19 = math.sqrt %18 : vector<16x128xf32>
      %20 = vector.shape_cast %19 : vector<16x128xf32> to vector<2x8x128xf32>
      %cst_8 = arith.constant dense<0.000000e+00> : vector<8x128xf32>
      %21 = vector.multi_reduction <add>, %20, %cst_8 [0] : vector<2x8x128xf32> to vector<8x128xf32>
      %c0_9 = arith.constant 0 : index
      %c0_10 = arith.constant 0 : index
      %c0_11 = arith.constant 0 : index
      %22 = vector.load %arg4[%c0_9, %c0_10, %c0_11] : memref<1x8x128xf32, #tpu.memory_space<vmem>>, vector<1x8x128xf32>
      %23 = vector.shape_cast %21 : vector<8x128xf32> to vector<1x8x128xf32>
      %24 = arith.addf %22, %23 : vector<1x8x128xf32>
      %c0_12 = arith.constant 0 : index
      %c0_13 = arith.constant 0 : index
      %c0_14 = arith.constant 0 : index
      %25 = vector.load %arg4[%c0_12, %c0_13, %c0_14] : memref<1x8x128xf32, #tpu.memory_space<vmem>>, vector<1x8x128xf32>
      tpu.vector_store %arg4[%c0_12, %c0_13, %c0_14], %24 {strides = array<i32>} : memref<1x8x128xf32, #tpu.memory_space<vmem>>, vector<1x8x128xf32>,
    } else {
    }
    %true = arith.constant true
    %10 = arith.xori %7, %true : i1
    %11 = arith.extui %10 : i1 to i32
    %c0_i32_4 = arith.constant 0 : i32
    %12 = arith.cmpi ne, %11, %c0_i32_4 : i32
    scf.if %12 {
      %c2048_i32_5 = arith.constant 2048 : i32
      %13 = arith.subi %c2048_i32_5, %5 : i32
      %14 = tpu.iota {dimensions = array<i32: 0>} : vector<16x128xi32>
      %15 = tpu.iota {dimensions = array<i32: 1>} : vector<16x128xi32>
      %c128_i32 = arith.constant 128 : i32
      %16 = vector.broadcast %c128_i32 : i32 to vector<16x128xi32>
      %17 = arith.muli %14, %16 : vector<16x128xi32>
      %18 = arith.addi %17, %15 : vector<16x128xi32>
      %19 = vector.broadcast %13 : i32 to vector<16x128xi32>
      %20 = arith.cmpi slt, %18, %19 : vector<16x128xi32>
      %c0 = arith.constant 0 : index
      %c0_6 = arith.constant 0 : index
      %21 = vector.load %arg2[%c0, %c0_6] : memref<16x128xf32, #tpu.memory_space<vmem>>, vector<16x128xf32>
      %c0_7 = arith.constant 0 : index
      %c0_8 = arith.constant 0 : index
      %22 = vector.load %arg3[%c0_7, %c0_8] : memref<16x128xf32, #tpu.memory_space<vmem>>, vector<16x128xf32>
      %23 = arith.subf %21, %22 : vector<16x128xf32>
      %24 = arith.mulf %23, %23 : vector<16x128xf32>
      %cst = arith.constant 9.99999997E-7 : f32
      %25 = vector.broadcast %cst : f32 to vector<16x128xf32>
      %26 = arith.addf %24, %25 : vector<16x128xf32>
      %27 = math.sqrt %26 : vector<16x128xf32>
      %cst_9 = arith.constant 0.000000e+00 : f32
      %28 = vector.broadcast %cst_9 : f32 to vector<16x128xf32>
      %29 = arith.select %20, %27, %28 : vector<16x128xi1>, vector<16x128xf32>
      %30 = vector.shape_cast %29 : vector<16x128xf32> to vector<2x8x128xf32>
      %cst_10 = arith.constant dense<0.000000e+00> : vector<8x128xf32>
      %31 = vector.multi_reduction <add>, %30, %cst_10 [0] : vector<2x8x128xf32> to vector<8x128xf32>
      %c0_11 = arith.constant 0 : index
      %c0_12 = arith.constant 0 : index
      %c0_13 = arith.constant 0 : index
      %32 = vector.load %arg4[%c0_11, %c0_12, %c0_13] : memref<1x8x128xf32, #tpu.memory_space<vmem>>, vector<1x8x128xf32>
      %33 = vector.shape_cast %31 : vector<8x128xf32> to vector<1x8x128xf32>
      %34 = arith.addf %32, %33 : vector<1x8x128xf32>
      %c0_14 = arith.constant 0 : index
      %c0_15 = arith.constant 0 : index
      %c0_16 = arith.constant 0 : index
      %35 = vector.load %arg4[%c0_14, %c0_15, %c0_16] : memref<1x8x128xf32, #tpu.memory_space<vmem>>, vector<1x8x128xf32>
      tpu.vector_store %arg4[%c0_14, %c0_15, %c0_16], %34 {strides = array<i32>} : memref<1x8x128xf32, #tpu.memory_space<vmem>>, vector<1x8x128xf32>,
    } else {
    }
    return
  }
  func.func @transform_0(%arg0: i32, %arg1: i32) -> (i32, i32) {
    %c1_i32 = arith.constant 1 : i32
    %0 = arith.muli %arg0, %c1_i32 : i32
    %1 = arith.addi %0, %arg1 : i32
    %c0_i32 = arith.constant 0 : i32
    %2 = arith.minsi %1, %c0_i32 : i32
    %c0_i32_0 = arith.constant 0 : i32
    %c0_i32_1 = arith.constant 0 : i32
    return %2, %c0_i32_0 : i32, i32
  }
  func.func @transform_1(%arg0: i32, %arg1: i32) -> (i32, i32) {
    %c1_i32 = arith.constant 1 : i32
    %0 = arith.muli %arg0, %c1_i32 : i32
    %1 = arith.addi %0, %arg1 : i32
    %c0_i32 = arith.constant 0 : i32
    %2 = arith.minsi %1, %c0_i32 : i32
    %c0_i32_0 = arith.constant 0 : i32
    %c0_i32_1 = arith.constant 0 : i32
    return %2, %c0_i32_0 : i32, i32
  }
  func.func @transform_2(%arg0: i32, %arg1: i32) -> (i32, i32, i32) {
    %c0_i32 = arith.constant 0 : i32
    %c0_i32_0 = arith.constant 0 : i32
    %c0_i32_1 = arith.constant 0 : i32
    return %arg0, %c0_i32, %c0_i32_0 : i32, i32, i32
  }
}

</mosaic_0001>

<bundles_post_ra>
// kernel: charbonnier_loss.1
= control target key start
LH: loop header
LB: loop body
LE: loop exit
PB: predicated region body
PF: predicated region fallthrough
CT: control target
= control target key end

     0   :  { %s213_s0 = inlined_call_operand.vmem [shape: f32[16,128], index: 0, kind: input, shape index: {}]   ;;  %s214_s1 = inlined_call_operand.vmem [shape: f32[16,128], index: 1, kind: input, shape index: {}]   ;;  %s215_s2 = inlined_call_operand.vmem [shape: f32[1,8,128], index: 2, kind: output, shape index: {}]  }
   0x1   :  { %v87_v0 = vld [vmem:[%s213_s0] sm:$0xff]  ;;  %v88_v1 = vld [vmem:[%s213_s0 + $0x8] sm:$0xff] }
   0x2   :  { %v89_v2 = vld [vmem:[%s214_s1] sm:$0xff]  ;;  %v90_v3 = vld [vmem:[%s214_s1 + $0x8] sm:$0xff] }
   0x3   :  { %v91_v4 = vsub.f32 %v87_v0, %v89_v2  ;;  %v92_v5 = vsub.f32 %v88_v1, %v90_v3 }
   0x5   :  { %v93_v6 = vmul.f32 %v91_v4, %v91_v4  ;;  %v94_v7 = vmul.f32 %v92_v5, %v92_v5 }
   0x7   :  { %v95_v8 = vadd.f32 1e-06, %v93_v6  ;;  %v96_v9 = vadd.f32 1e-06, %v94_v7 }
   0x9   :  { %179 = vrsqrt.f32 %v95_v8  ;;  %vm99_vm0 = vcmp.eq.f32.partialorder %v95_v8, inf  ;;  %v102_v11 = vand.u32 2147483648, %v95_v8  ;;  %vm101_vm1 = vcmp.eq.f32.partialorder %v95_v8, 0.0 }
   0xa   :  { %181 = vrsqrt.f32 %v96_v9  ;;  %vm106_vm2 = vcmp.eq.f32.partialorder %v96_v9, inf  ;;  %v109_v14 = vand.u32 2147483648, %v96_v9  ;;  %vm108_vm3 = vcmp.eq.f32.partialorder %v96_v9, 0.0 }
  0x13   :  { %v180_v10 = vpop.eup %179 }
  0x14   :  { %v182_v12 = vpop.eup %181  ;;  %v98_v13 = vmul.f32 %v180_v10, %v95_v8 }
  0x15   :  { %v105_v15 = vmul.f32 %v182_v12, %v96_v9 }
  0x16   :  { %v100_v16 = vsel %vm99_vm0, %v95_v8, %v98_v13 }
  0x17   :  { %v103_v17 = vsel %vm101_vm1, %v102_v11, %v100_v16  ;;  %v107_v18 = vsel %vm106_vm2, %v96_v9, %v105_v15 }
  0x18   :  { %v110_v19 = vsel %vm108_vm3, %v109_v14, %v107_v18 }
  0x19   :  { %v111_v20 = vadd.f32 %v110_v19, %v103_v17 }
  0x1b   :  { %114 = vst [vmem:[%s215_s2] sm:$0xff] %v111_v20 }

</bundles_post_ra>
